<compile_context>
chip_gen: v7x
topology: tpu7x:2x2x1
jax: 0.10.0
libtpu: 0.0.40
codegen_flags: <defaults>
</compile_context>

<pallas_src>
import math
from functools import partial

import jax
import jax.numpy as jnp
from jax.experimental import pallas as pl
from jax.experimental.pallas import tpu as pltpu


# ----------------------------- in-kernel helpers ------------------------------


def _layernorm_f32(x, g, b, eps):
    mu = jnp.mean(x, axis=-1, keepdims=True)
    xc = x - mu
    var = jnp.mean(xc * xc, axis=-1, keepdims=True)
    return xc * jax.lax.rsqrt(var + eps) * g + b


def _gelu_f32(x):
    # TODO(synk): HF BERT default is exact (erf) GELU; tanh approximation used here.
    return 0.5 * x * (1.0 + jnp.tanh(0.7978845608028654 * (x + 0.044715 * x * x * x)))


# ------------------------------ Pallas kernels --------------------------------


def _emb_layernorm_kernel(x_ref, g_ref, b_ref, o_ref, *, eps):
    o_ref[...] = _layernorm_f32(x_ref[...], g_ref[...], b_ref[...], eps).astype(o_ref.dtype)


def pallas_emb_layernorm(x, gamma, beta, eps=1e-12):
    M, H = x.shape
    return pl.pallas_call(
        partial(_emb_layernorm_kernel, eps=eps),
        grid=(1,),
        in_specs=[
            pl.BlockSpec((M, H), lambda i: (0, 0)),
            pl.BlockSpec((1, H), lambda i: (0, 0)),
            pl.BlockSpec((1, H), lambda i: (0, 0)),
        ],
        out_specs=pl.BlockSpec((M, H), lambda i: (0, 0)),
        out_shape=jax.ShapeDtypeStruct((M, H), jnp.float32),
    )(x, gamma, beta)


def _encoder_layer_kernel(x_ref, bias_ref, wqkv_ref, bqkv_ref, wo_ref, bo_ref,
                          ln1_g_ref, ln1_b_ref, w1_ref, b1_ref, w2_ref, b2_ref,
                          ln2_g_ref, ln2_b_ref, o_ref, *, num_heads, head_dim, eps):
    x = x_ref[...]                       # (S, H) f32: tokens of one batch element
    bias = bias_ref[...]                 # (1, S) additive key mask
    S = x.shape[0]
    H = num_heads * head_dim

    # ---- fused QKV projection (softmax scale already folded into the Q columns) ----
    qkv = jnp.dot(x.astype(jnp.bfloat16), wqkv_ref[...],
                  preferred_element_type=jnp.float32) + bqkv_ref[...]      # (S, 3H) f32

    # ---- per-head attention; heads are static lane-axis slices.
    #      merge_heads is folded into per-head row-slices of Wo and accumulated. ----
    attn = jnp.zeros((S, H), dtype=jnp.float32)
    for h in range(num_heads):
        lo = h * head_dim
        qh = qkv[:, lo:lo + head_dim].astype(jnp.bfloat16)
        kh = qkv[:, H + lo:H + lo + head_dim].astype(jnp.bfloat16)
        vh = qkv[:, 2 * H + lo:2 * H + lo + head_dim].astype(jnp.bfloat16)
        s = jax.lax.dot_general(qh, kh, (((1,), (1,)), ((), ())),
                                preferred_element_type=jnp.float32)        # (S, S) = q @ k^T
        s = s + bias
        p = jnp.exp(s - jnp.max(s, axis=-1, keepdims=True))
        p = p * pl.reciprocal(jnp.sum(p, axis=-1, keepdims=True), approx=True)  # EUP recip
        ctx_h = jnp.dot(p.astype(jnp.bfloat16), vh,
                        preferred_element_type=jnp.float32)                # (S, Dh)
        attn = attn + jnp.dot(ctx_h.astype(jnp.bfloat16),
                              wo_ref[lo:lo + head_dim, :],                 # (Dh, H) slice of Wo
                              preferred_element_type=jnp.float32)
    attn_out = attn + bo_ref[...]

    # ---- residual + LN1 ----
    x1 = _layernorm_f32(attn_out + x, ln1_g_ref[...], ln1_b_ref[...], eps)

    # ---- FFN + residual + LN2 ----
    hmid = jnp.dot(x1.astype(jnp.bfloat16), w1_ref[...],
                   preferred_element_type=jnp.float32) + b1_ref[...]
    hmid = _gelu_f32(hmid)
    ffn = jnp.dot(hmid.astype(jnp.bfloat16), w2_ref[...],
                  preferred_element_type=jnp.float32) + b2_ref[...]
    o_ref[...] = _layernorm_f32(ffn + x1, ln2_g_ref[...], ln2_b_ref[...], eps).astype(o_ref.dtype)


def pallas_encoder_layer(x, bias, lyr, *, batch, seq, num_heads, head_dim, eps=1e-12):
    T, H = x.shape
    I = lyr["w1"].shape[1]
    S = seq

    operands = (x, bias, lyr["wqkv"], lyr["bqkv"], lyr["wo"], lyr["bo"],
                lyr["ln1_g"], lyr["ln1_b"], lyr["w1"], lyr["b1"],
                lyr["w2"], lyr["b2"], lyr["ln2_g"], lyr["ln2_b"])
    flops = 2 * batch * S * (3 * H * H + 2 * num_heads * S * head_dim + H * H + 2 * H * I)
    transcendentals = batch * S * (num_heads * (S + 1) + I + 2)
    bytes_accessed = sum(int(a.size) * a.dtype.itemsize for a in operands) + T * H * 4

    def weight2d(shape):
        return pl.BlockSpec(shape, lambda b: (0, 0))   # batch-independent -> stays resident

    return pl.pallas_call(
        partial(_encoder_layer_kernel, num_heads=num_heads, head_dim=head_dim, eps=eps),
        grid=(batch,),
        in_specs=[
            pl.BlockSpec((S, H), lambda b: (b, 0)),            # tokens of batch b
            pl.BlockSpec((None, 1, S), lambda b: (b, 0, 0)),   # additive mask (leading dim squeezed)
            weight2d((H, 3 * H)), weight2d((1, 3 * H)),        # fused QKV (bf16, scale-folded)
            weight2d((H, H)), weight2d((1, H)),                # Wo, bo
            weight2d((1, H)), weight2d((1, H)),                # LN1 gamma/beta
            weight2d((H, I)), weight2d((1, I)),                # W1, b1
            weight2d((I, H)), weight2d((1, H)),                # W2, b2
            weight2d((1, H)), weight2d((1, H)),                # LN2 gamma/beta
        ],
        out_specs=pl.BlockSpec((S, H), lambda b: (b, 0)),
        out_shape=jax.ShapeDtypeStruct((T, H), jnp.float32),
        compiler_params=pltpu.CompilerParams(dimension_semantics=("parallel",)),
        cost_estimate=pl.CostEstimate(flops=int(flops),
                                      transcendentals=int(transcendentals),
                                      bytes_accessed=int(bytes_accessed)),
    )(*operands)


def _pooler_head_kernel(cls_ref, pw_ref, pb_ref, dw_ref, db_ref, o_ref):
    pooled = jnp.tanh(
        jnp.dot(cls_ref[...].astype(jnp.bfloat16), pw_ref[...],
                preferred_element_type=jnp.float32) + pb_ref[...])
    logit = jnp.dot(pooled.astype(jnp.bfloat16), dw_ref[...],
                    preferred_element_type=jnp.float32) + db_ref[...]
    # numerically stable sigmoid
    z = jnp.exp(-jnp.abs(logit))
    o_ref[...] = jnp.where(logit >= 0.0, 1.0 / (1.0 + z), z / (1.0 + z)).astype(o_ref.dtype)


def pallas_pooler_head(cls, pool_w, pool_b, disc_w, disc_b):
    B, H = cls.shape
    return pl.pallas_call(
        _pooler_head_kernel,
        grid=(1,),
        in_specs=[
            pl.BlockSpec((B, H), lambda i: (0, 0)),
            pl.BlockSpec((H, H), lambda i: (0, 0)),
            pl.BlockSpec((1, H), lambda i: (0, 0)),
            pl.BlockSpec((H, 1), lambda i: (0, 0)),
            pl.BlockSpec((1, 1), lambda i: (0, 0)),
        ],
        out_specs=pl.BlockSpec((B, 1), lambda i: (0, 0)),
        out_shape=jax.ShapeDtypeStruct((B, 1), jnp.float32),
    )(cls, pool_w, pool_b, disc_w, disc_b)


# --------------------------- model definition ------------------------------

CFG = dict(
    vocab_size=100,
    hidden_size=32,
    num_layers=2,
    num_heads=2,
    intermediate_size=64,
    max_position_embeddings=16,
    type_vocab_size=2,
)


def init_params(key, cfg):
    H, I = cfg["hidden_size"], cfg["intermediate_size"]

    def normal(k, shape):
        return 0.02 * jax.random.normal(k, shape, jnp.float32)

    keys = iter(jax.random.split(key, 64))
    p = {
        "word_emb": normal(next(keys), (cfg["vocab_size"], H)),
        "pos_emb": normal(next(keys), (cfg["max_position_embeddings"], H)),
        "type_emb": normal(next(keys), (cfg["type_vocab_size"], H)),
        "emb_ln_g": jnp.ones((1, H), jnp.float32),
        "emb_ln_b": jnp.zeros((1, H), jnp.float32),
        "layers": [],
        "pool_w": normal(next(keys), (H, H)),
        "pool_b": jnp.zeros((1, H), jnp.float32),
        "disc_w": normal(next(keys), (H, 1)),
        "disc_b": jnp.zeros((1, 1), jnp.float32),
    }
    for _ in range(cfg["num_layers"]):
        p["layers"].append(
            {
                "wq": normal(next(keys), (H, H)), "bq": jnp.zeros((1, H), jnp.float32),
                "wk": normal(next(keys), (H, H)), "bk": jnp.zeros((1, H), jnp.float32),
                "wv": normal(next(keys), (H, H)), "bv": jnp.zeros((1, H), jnp.float32),
                "wo": normal(next(keys), (H, H)), "bo": jnp.zeros((1, H), jnp.float32),
                "ln1_g": jnp.ones((1, H), jnp.float32), "ln1_b": jnp.zeros((1, H), jnp.float32),
                "w1": normal(next(keys), (H, I)), "b1": jnp.zeros((1, I), jnp.float32),
                "w2": normal(next(keys), (I, H)), "b2": jnp.zeros((1, H), jnp.float32),
                "ln2_g": jnp.ones((1, H), jnp.float32), "ln2_b": jnp.zeros((1, H), jnp.float32),
            }
        )
    return p


def prepare_params(params, cfg):
    """Fuse Q|K|V into one (H,3H) weight with the 1/sqrt(Dh) scale baked into the Q part,
    and cast matmul weights to bf16 for the MXU (biases / LN params stay f32)."""
    H, nH = cfg["hidden_size"], cfg["num_heads"]
    scale = 1.0 / math.sqrt(H // nH)
    fp = {
        "word_emb": params["word_emb"], "pos_emb": params["pos_emb"], "type_emb": params["type_emb"],
        "emb_ln_g": params["emb_ln_g"], "emb_ln_b": params["emb_ln_b"],
        "pool_w": params["pool_w"].astype(jnp.bfloat16), "pool_b": params["pool_b"],
        "disc_w": params["disc_w"].astype(jnp.bfloat16), "disc_b": params["disc_b"],
        "layers": [],
    }
    for lyr in params["layers"]:
        fp["layers"].append({
            "wqkv": jnp.concatenate([lyr["wq"] * scale, lyr["wk"], lyr["wv"]],
                                    axis=1).astype(jnp.bfloat16),
            "bqkv": jnp.concatenate([lyr["bq"] * scale, lyr["bk"], lyr["bv"]], axis=1),
            "wo": lyr["wo"].astype(jnp.bfloat16), "bo": lyr["bo"],
            "ln1_g": lyr["ln1_g"], "ln1_b": lyr["ln1_b"],
            "w1": lyr["w1"].astype(jnp.bfloat16), "b1": lyr["b1"],
            "w2": lyr["w2"].astype(jnp.bfloat16), "b2": lyr["b2"],
            "ln2_g": lyr["ln2_g"], "ln2_b": lyr["ln2_b"],
        })
    return fp


def bert_classifier_forward(fparams, input_ids, attention_mask=None, token_type_ids=None, cfg=CFG):
    B, S = input_ids.shape
    H, nH = cfg["hidden_size"], cfg["num_heads"]
    Dh = H // nH
    if attention_mask is None:
        attention_mask = jnp.ones((B, S), jnp.float32)
    if token_type_ids is None:
        token_type_ids = jnp.zeros((B, S), jnp.int32)

    # Embeddings: table gathers stay in plain-JAX glue; the norm runs in Pallas
    # (dedicated residual-free LN kernel — no zeros residual DMA).
    tok = jnp.take(fparams["word_emb"], input_ids, axis=0)              # (B,S,H)
    pos = fparams["pos_emb"][:S][None, :, :]                            # (1,S,H)
    typ = jnp.take(fparams["type_emb"], token_type_ids, axis=0)         # (B,S,H)
    emb = (tok + pos + typ).reshape(B * S, H)
    x = pallas_emb_layernorm(emb, fparams["emb_ln_g"], fparams["emb_ln_b"])

    # HF-style additive attention mask: (1 - mask) * -10000, one row per batch element.
    bias = ((1.0 - attention_mask.astype(jnp.float32)) * -10000.0).reshape(B, 1, S)

    # One fused Pallas kernel per encoder layer.
    for lyr in fparams["layers"]:
        x = pallas_encoder_layer(x, bias, lyr, batch=B, seq=S, num_heads=nH, head_dim=Dh)

    cls = x.reshape(B, S, H)[:, 0, :]                                    # (B, H) pooler input
    # pooler (tanh) + discriminator (Linear(H,1) -> Sigmoid) fused into one tail kernel
    return pallas_pooler_head(cls, fparams["pool_w"], fparams["pool_b"],
                              fparams["disc_w"], fparams["disc_b"])      # (B, 1)


if __name__ == "__main__":
    key = jax.random.PRNGKey(0)
    pkey, dkey = jax.random.split(key)
    params = init_params(pkey, CFG)
    fparams = prepare_params(params, CFG)

    B, S = 2, 8
    input_ids = jax.random.randint(dkey, (B, S), 0, CFG["vocab_size"], dtype=jnp.int32)
    attention_mask = jnp.ones((B, S), jnp.float32)
    token_type_ids = jnp.zeros((B, S), jnp.int32)

    fwd = jax.jit(bert_classifier_forward)
    out = jax.block_until_ready(fwd(fparams, input_ids, attention_mask, token_type_ids))
    assert out.shape == (B, 1)
    assert bool(jnp.all((out >= 0.0) & (out <= 1.0)))
    print("KERNEL_OK")
</pallas_src>

<mosaic_0001>
module attributes {stable_mosaic.version = 11 : i64} {
  func.func @_emb_layernorm_kernel(%arg0: i32, %arg1: memref<16x32xf32, #tpu.memory_space<vmem>>, %arg2: memref<1x32xf32, #tpu.memory_space<vmem>>, %arg3: memref<1x32xf32, #tpu.memory_space<vmem>>, %arg4: memref<16x32xf32, #tpu.memory_space<vmem>>) attributes {dimension_semantics = [#tpu.dimension_semantics<arbitrary>], iteration_bounds = array<i64: 1>, scalar_prefetch = 0 : i64, scratch_operands = 0 : i64, tpu.core_type = #tpu.core_type<tc>, window_params = [{pipeline_mode = #tpu.pipeline_mode<synchronous>, transform_indices = @transform_0, window_bounds = array<i64: 16, 32>}, {pipeline_mode = #tpu.pipeline_mode<synchronous>, transform_indices = @transform_1, window_bounds = array<i64: 1, 32>}, {pipeline_mode = #tpu.pipeline_mode<synchronous>, transform_indices = @transform_2, window_bounds = array<i64: 1, 32>}, {pipeline_mode = #tpu.pipeline_mode<synchronous>, transform_indices = @transform_3, window_bounds = array<i64: 16, 32>}]} {
    %c0 = arith.constant 0 : index
    %c0_0 = arith.constant 0 : index
    %0 = vector.load %arg1[%c0, %c0_0] : memref<16x32xf32, #tpu.memory_space<vmem>>, vector<16x32xf32>
    %c0_1 = arith.constant 0 : index
    %c0_2 = arith.constant 0 : index
    %1 = vector.load %arg2[%c0_1, %c0_2] : memref<1x32xf32, #tpu.memory_space<vmem>>, vector<1x32xf32>
    %c0_3 = arith.constant 0 : index
    %c0_4 = arith.constant 0 : index
    %2 = vector.load %arg3[%c0_3, %c0_4] : memref<1x32xf32, #tpu.memory_space<vmem>>, vector<1x32xf32>
    %cst = arith.constant dense<0.000000e+00> : vector<16xf32>
    %3 = vector.multi_reduction <add>, %0, %cst [1] : vector<16x32xf32> to vector<16xf32>
    %4 = vector.shape_cast %3 : vector<16xf32> to vector<16x1xf32>
    %cst_5 = arith.constant 3.200000e+01 : f32
    %5 = vector.broadcast %cst_5 : f32 to vector<16x1xf32>
    %6 = arith.divf %4, %5 : vector<16x1xf32>
    %7 = vector.broadcast %6 : vector<16x1xf32> to vector<16x32xf32>
    %8 = arith.subf %0, %7 : vector<16x32xf32>
    %9 = arith.mulf %8, %8 : vector<16x32xf32>
    %cst_6 = arith.constant dense<0.000000e+00> : vector<16xf32>
    %10 = vector.multi_reduction <add>, %9, %cst_6 [1] : vector<16x32xf32> to vector<16xf32>
    %11 = vector.shape_cast %10 : vector<16xf32> to vector<16x1xf32>
    %cst_7 = arith.constant 3.200000e+01 : f32
    %12 = vector.broadcast %cst_7 : f32 to vector<16x1xf32>
    %13 = arith.divf %11, %12 : vector<16x1xf32>
    %cst_8 = arith.constant 9.99999996E-13 : f32
    %14 = vector.broadcast %cst_8 : f32 to vector<16x1xf32>
    %15 = arith.addf %13, %14 : vector<16x1xf32>
    %16 = math.rsqrt %15 : vector<16x1xf32>
    %17 = vector.broadcast %16 : vector<16x1xf32> to vector<16x32xf32>
    %18 = arith.mulf %8, %17 : vector<16x32xf32>
    %19 = vector.broadcast %1 : vector<1x32xf32> to vector<16x32xf32>
    %20 = arith.mulf %18, %19 : vector<16x32xf32>
    %21 = vector.broadcast %2 : vector<1x32xf32> to vector<16x32xf32>
    %22 = arith.addf %20, %21 : vector<16x32xf32>
    %c0_9 = arith.constant 0 : index
    %c0_10 = arith.constant 0 : index
    %23 = vector.load %arg4[%c0_9, %c0_10] : memref<16x32xf32, #tpu.memory_space<vmem>>, vector<16x32xf32>
    tpu.vector_store %arg4[%c0_9, %c0_10], %22 {strides = array<i32>} : memref<16x32xf32, #tpu.memory_space<vmem>>, vector<16x32xf32>,
    return
  }
  func.func @transform_0(%arg0: i32) -> (i32, i32) {
    %c0_i32 = arith.constant 0 : i32
    %c0_i32_0 = arith.constant 0 : i32
    %c0_i32_1 = arith.constant 0 : i32
    return %c0_i32, %c0_i32_0 : i32, i32
  }
  func.func @transform_1(%arg0: i32) -> (i32, i32) {
    %c0_i32 = arith.constant 0 : i32
    %c0_i32_0 = arith.constant 0 : i32
    %c0_i32_1 = arith.constant 0 : i32
    return %c0_i32, %c0_i32_0 : i32, i32
  }
  func.func @transform_2(%arg0: i32) -> (i32, i32) {
    %c0_i32 = arith.constant 0 : i32
    %c0_i32_0 = arith.constant 0 : i32
    %c0_i32_1 = arith.constant 0 : i32
    return %c0_i32, %c0_i32_0 : i32, i32
  }
  func.func @transform_3(%arg0: i32) -> (i32, i32) {
    %c0_i32 = arith.constant 0 : i32
    %c0_i32_0 = arith.constant 0 : i32
    %c0_i32_1 = arith.constant 0 : i32
    return %c0_i32, %c0_i32_0 : i32, i32
  }
}

module attributes {stable_mosaic.version = 11 : i64} {
  func.func @_encoder_layer_kernel(%arg0: i32, %arg1: memref<8x32xf32, #tpu.memory_space<vmem>>, %arg2: memref<1x1x8xf32, #tpu.memory_space<vmem>>, %arg3: memref<32x96xbf16, #tpu.memory_space<vmem>>, %arg4: memref<1x96xf32, #tpu.memory_space<vmem>>, %arg5: memref<32x32xbf16, #tpu.memory_space<vmem>>, %arg6: memref<1x32xf32, #tpu.memory_space<vmem>>, %arg7: memref<1x32xf32, #tpu.memory_space<vmem>>, %arg8: memref<1x32xf32, #tpu.memory_space<vmem>>, %arg9: memref<32x64xbf16, #tpu.memory_space<vmem>>, %arg10: memref<1x64xf32, #tpu.memory_space<vmem>>, %arg11: memref<64x32xbf16, #tpu.memory_space<vmem>>, %arg12: memref<1x32xf32, #tpu.memory_space<vmem>>, %arg13: memref<1x32xf32, #tpu.memory_space<vmem>>, %arg14: memref<1x32xf32, #tpu.memory_space<vmem>>, %arg15: memref<8x32xf32, #tpu.memory_space<vmem>>) attributes {dimension_semantics = [#tpu.dimension_semantics<parallel>], iteration_bounds = array<i64: 2>, scalar_prefetch = 0 : i64, scratch_operands = 0 : i64, tpu.core_type = #tpu.core_type<tc>, window_params = [{transform_indices = @transform_0, window_bounds = array<i64: 8, 32>}, {transform_indices = @transform_1, window_bounds = array<i64: 1, 1, 8>}, {pipeline_mode = #tpu.pipeline_mode<synchronous>, transform_indices = @transform_2, window_bounds = array<i64: 32, 96>}, {pipeline_mode = #tpu.pipeline_mode<synchronous>, transform_indices = @transform_3, window_bounds = array<i64: 1, 96>}, {pipeline_mode = #tpu.pipeline_mode<synchronous>, transform_indices = @transform_4, window_bounds = array<i64: 32, 32>}, {pipeline_mode = #tpu.pipeline_mode<synchronous>, transform_indices = @transform_5, window_bounds = array<i64: 1, 32>}, {pipeline_mode = #tpu.pipeline_mode<synchronous>, transform_indices = @transform_6, window_bounds = array<i64: 1, 32>}, {pipeline_mode = #tpu.pipeline_mode<synchronous>, transform_indices = @transform_7, window_bounds = array<i64: 1, 32>}, {pipeline_mode = #tpu.pipeline_mode<synchronous>, transform_indices = @transform_8, window_bounds = array<i64: 32, 64>}, {pipeline_mode = #tpu.pipeline_mode<synchronous>, transform_indices = @transform_9, window_bounds = array<i64: 1, 64>}, {pipeline_mode = #tpu.pipeline_mode<synchronous>, transform_indices = @transform_10, window_bounds = array<i64: 64, 32>}, {pipeline_mode = #tpu.pipeline_mode<synchronous>, transform_indices = @transform_11, window_bounds = array<i64: 1, 32>}, {pipeline_mode = #tpu.pipeline_mode<synchronous>, transform_indices = @transform_12, window_bounds = array<i64: 1, 32>}, {pipeline_mode = #tpu.pipeline_mode<synchronous>, transform_indices = @transform_13, window_bounds = array<i64: 1, 32>}, {transform_indices = @transform_14, window_bounds = array<i64: 8, 32>}]} {
    %c0 = arith.constant 0 : index
    %c0_0 = arith.constant 0 : index
    %0 = vector.load %arg1[%c0, %c0_0] : memref<8x32xf32, #tpu.memory_space<vmem>>, vector<8x32xf32>
    %c0_1 = arith.constant 0 : index
    %c0_2 = arith.constant 0 : index
    %c0_3 = arith.constant 0 : index
    %1 = vector.load %arg2[%c0_1, %c0_2, %c0_3] : memref<1x1x8xf32, #tpu.memory_space<vmem>>, vector<1x1x8xf32>
    %2 = vector.shape_cast %1 : vector<1x1x8xf32> to vector<1x8xf32>
    %3 = arith.truncf %0 : vector<8x32xf32> to vector<8x32xbf16>
    %c0_4 = arith.constant 0 : index
    %c0_5 = arith.constant 0 : index
    %4 = vector.load %arg3[%c0_4, %c0_5] : memref<32x96xbf16, #tpu.memory_space<vmem>>, vector<32x96xbf16>
    %cst = arith.constant dense<0.000000e+00> : vector<8x96xf32>
    %5 = tpu.matmul %3, %4, %cst {dimension_numbers = #tpu.dot_dimension_numbers<[1], [0], [0], [1], [0, 0, 1, 1], [], []>} : vector<8x32xbf16>, vector<32x96xbf16>, vector<8x96xf32> -> vector<8x96xf32>
    %c0_6 = arith.constant 0 : index
    %c0_7 = arith.constant 0 : index
    %6 = vector.load %arg4[%c0_6, %c0_7] : memref<1x96xf32, #tpu.memory_space<vmem>>, vector<1x96xf32>
    %7 = vector.broadcast %6 : vector<1x96xf32> to vector<8x96xf32>
    %8 = arith.addf %5, %7 : vector<8x96xf32>
    %cst_8 = arith.constant 0.000000e+00 : f32
    %9 = vector.broadcast %cst_8 : f32 to vector<8x32xf32>
    %10 = vector.extract_strided_slice %8 {offsets = [0, 0], sizes = [8, 16], strides = [1, 1]} : vector<8x96xf32> to vector<8x16xf32>
    %11 = arith.truncf %10 : vector<8x16xf32> to vector<8x16xbf16>
    %12 = vector.extract_strided_slice %8 {offsets = [0, 32], sizes = [8, 16], strides = [1, 1]} : vector<8x96xf32> to vector<8x16xf32>
    %13 = arith.truncf %12 : vector<8x16xf32> to vector<8x16xbf16>
    %14 = vector.extract_strided_slice %8 {offsets = [0, 64], sizes = [8, 16], strides = [1, 1]} : vector<8x96xf32> to vector<8x16xf32>
    %15 = arith.truncf %14 : vector<8x16xf32> to vector<8x16xbf16>
    %cst_9 = arith.constant dense<0.000000e+00> : vector<8x8xf32>
    %16 = tpu.matmul %11, %13, %cst_9 {dimension_numbers = #tpu.dot_dimension_numbers<[1], [1], [0], [0], [0, 0, 1, 0], [], []>} : vector<8x16xbf16>, vector<8x16xbf16>, vector<8x8xf32> -> vector<8x8xf32>
    %17 = vector.broadcast %2 : vector<1x8xf32> to vector<8x8xf32>
    %18 = arith.addf %16, %17 : vector<8x8xf32>
    %cst_10 = arith.constant dense<0xFF800000> : vector<8xf32>
    %19 = vector.multi_reduction <maximumf>, %18, %cst_10 [1] : vector<8x8xf32> to vector<8xf32>
    %20 = vector.shape_cast %19 : vector<8xf32> to vector<8x1xf32>
    %21 = vector.broadcast %20 : vector<8x1xf32> to vector<8x8xf32>
    %22 = arith.subf %18, %21 : vector<8x8xf32>
    %23 = math.exp %22 : vector<8x8xf32>
    %cst_11 = arith.constant dense<0.000000e+00> : vector<8xf32>
    %24 = vector.multi_reduction <add>, %23, %cst_11 [1] : vector<8x8xf32> to vector<8xf32>
    %25 = vector.shape_cast %24 : vector<8xf32> to vector<8x1xf32>
    %26 = tpu.reciprocal %25 {approx = true} : vector<8x1xf32> -> vector<8x1xf32>
    %27 = vector.broadcast %26 : vector<8x1xf32> to vector<8x8xf32>
    %28 = arith.mulf %23, %27 : vector<8x8xf32>
    %29 = arith.truncf %28 : vector<8x8xf32> to vector<8x8xbf16>
    %cst_12 = arith.constant dense<0.000000e+00> : vector<8x16xf32>
    %30 = tpu.matmul %29, %15, %cst_12 {dimension_numbers = #tpu.dot_dimension_numbers<[1], [0], [0], [1], [0, 0, 1, 1], [], []>} : vector<8x8xbf16>, vector<8x16xbf16>, vector<8x16xf32> -> vector<8x16xf32>
    %31 = arith.truncf %30 : vector<8x16xf32> to vector<8x16xbf16>
    %c0_13 = arith.constant 0 : index
    %c0_14 = arith.constant 0 : index
    %32 = vector.load %arg5[%c0_13, %c0_14] : memref<32x32xbf16, #tpu.memory_space<vmem>>, vector<16x32xbf16>
    %cst_15 = arith.constant dense<0.000000e+00> : vector<8x32xf32>
    %33 = tpu.matmul %31, %32, %cst_15 {dimension_numbers = #tpu.dot_dimension_numbers<[1], [0], [0], [1], [0, 0, 1, 1], [], []>} : vector<8x16xbf16>, vector<16x32xbf16>, vector<8x32xf32> -> vector<8x32xf32>
    %34 = arith.addf %9, %33 : vector<8x32xf32>
    %35 = vector.extract_strided_slice %8 {offsets = [0, 16], sizes = [8, 16], strides = [1, 1]} : vector<8x96xf32> to vector<8x16xf32>
    %36 = arith.truncf %35 : vector<8x16xf32> to vector<8x16xbf16>
    %37 = vector.extract_strided_slice %8 {offsets = [0, 48], sizes = [8, 16], strides = [1, 1]} : vector<8x96xf32> to vector<8x16xf32>
    %38 = arith.truncf %37 : vector<8x16xf32> to vector<8x16xbf16>
    %39 = vector.extract_strided_slice %8 {offsets = [0, 80], sizes = [8, 16], strides = [1, 1]} : vector<8x96xf32> to vector<8x16xf32>
    %40 = arith.truncf %39 : vector<8x16xf32> to vector<8x16xbf16>
    %cst_16 = arith.constant dense<0.000000e+00> : vector<8x8xf32>
    %41 = tpu.matmul %36, %38, %cst_16 {dimension_numbers = #tpu.dot_dimension_numbers<[1], [1], [0], [0], [0, 0, 1, 0], [], []>} : vector<8x16xbf16>, vector<8x16xbf16>, vector<8x8xf32> -> vector<8x8xf32>
    %42 = vector.broadcast %2 : vector<1x8xf32> to vector<8x8xf32>
    %43 = arith.addf %41, %42 : vector<8x8xf32>
    %cst_17 = arith.constant dense<0xFF800000> : vector<8xf32>
    %44 = vector.multi_reduction <maximumf>, %43, %cst_17 [1] : vector<8x8xf32> to vector<8xf32>
    %45 = vector.shape_cast %44 : vector<8xf32> to vector<8x1xf32>
    %46 = vector.broadcast %45 : vector<8x1xf32> to vector<8x8xf32>
    %47 = arith.subf %43, %46 : vector<8x8xf32>
    %48 = math.exp %47 : vector<8x8xf32>
    %cst_18 = arith.constant dense<0.000000e+00> : vector<8xf32>
    %49 = vector.multi_reduction <add>, %48, %cst_18 [1] : vector<8x8xf32> to vector<8xf32>
    %50 = vector.shape_cast %49 : vector<8xf32> to vector<8x1xf32>
    %51 = tpu.reciprocal %50 {approx = true} : vector<8x1xf32> -> vector<8x1xf32>
    %52 = vector.broadcast %51 : vector<8x1xf32> to vector<8x8xf32>
    %53 = arith.mulf %48, %52 : vector<8x8xf32>
    %54 = arith.truncf %53 : vector<8x8xf32> to vector<8x8xbf16>
    %cst_19 = arith.constant dense<0.000000e+00> : vector<8x16xf32>
    %55 = tpu.matmul %54, %40, %cst_19 {dimension_numbers = #tpu.dot_dimension_numbers<[1], [0], [0], [1], [0, 0, 1, 1], [], []>} : vector<8x8xbf16>, vector<8x16xbf16>, vector<8x16xf32> -> vector<8x16xf32>
    %56 = arith.truncf %55 : vector<8x16xf32> to vector<8x16xbf16>
    %c16 = arith.constant 16 : index
    %c0_20 = arith.constant 0 : index
    %57 = vector.load %arg5[%c16, %c0_20] : memref<32x32xbf16, #tpu.memory_space<vmem>>, vector<16x32xbf16>
    %cst_21 = arith.constant dense<0.000000e+00> : vector<8x32xf32>
    %58 = tpu.matmul %56, %57, %cst_21 {dimension_numbers = #tpu.dot_dimension_numbers<[1], [0], [0], [1], [0, 0, 1, 1], [], []>} : vector<8x16xbf16>, vector<16x32xbf16>, vector<8x32xf32> -> vector<8x32xf32>
    %59 = arith.addf %34, %58 : vector<8x32xf32>
    %c0_22 = arith.constant 0 : index
    %c0_23 = arith.constant 0 : index
    %60 = vector.load %arg6[%c0_22, %c0_23] : memref<1x32xf32, #tpu.memory_space<vmem>>, vector<1x32xf32>
    %61 = vector.broadcast %60 : vector<1x32xf32> to vector<8x32xf32>
    %62 = arith.addf %59, %61 : vector<8x32xf32>
    %63 = arith.addf %62, %0 : vector<8x32xf32>
    %c0_24 = arith.constant 0 : index
    %c0_25 = arith.constant 0 : index
    %64 = vector.load %arg7[%c0_24, %c0_25] : memref<1x32xf32, #tpu.memory_space<vmem>>, vector<1x32xf32>
    %c0_26 = arith.constant 0 : index
    %c0_27 = arith.constant 0 : index
    %65 = vector.load %arg8[%c0_26, %c0_27] : memref<1x32xf32, #tpu.memory_space<vmem>>, vector<1x32xf32>
    %cst_28 = arith.constant dense<0.000000e+00> : vector<8xf32>
    %66 = vector.multi_reduction <add>, %63, %cst_28 [1] : vector<8x32xf32> to vector<8xf32>
    %67 = vector.shape_cast %66 : vector<8xf32> to vector<8x1xf32>
    %cst_29 = arith.constant 3.200000e+01 : f32
    %68 = vector.broadcast %cst_29 : f32 to vector<8x1xf32>
    %69 = arith.divf %67, %68 : vector<8x1xf32>
    %70 = vector.broadcast %69 : vector<8x1xf32> to vector<8x32xf32>
    %71 = arith.subf %63, %70 : vector<8x32xf32>
    %72 = arith.mulf %71, %71 : vector<8x32xf32>
    %cst_30 = arith.constant dense<0.000000e+00> : vector<8xf32>
    %73 = vector.multi_reduction <add>, %72, %cst_30 [1] : vector<8x32xf32> to vector<8xf32>
    %74 = vector.shape_cast %73 : vector<8xf32> to vector<8x1xf32>
    %cst_31 = arith.constant 3.200000e+01 : f32
    %75 = vector.broadcast %cst_31 : f32 to vector<8x1xf32>
    %76 = arith.divf %74, %75 : vector<8x1xf32>
    %cst_32 = arith.constant 9.99999996E-13 : f32
    %77 = vector.broadcast %cst_32 : f32 to vector<8x1xf32>
    %78 = arith.addf %76, %77 : vector<8x1xf32>
    %79 = math.rsqrt %78 : vector<8x1xf32>
    %80 = vector.broadcast %79 : vector<8x1xf32> to vector<8x32xf32>
    %81 = arith.mulf %71, %80 : vector<8x32xf32>
    %82 = vector.broadcast %64 : vector<1x32xf32> to vector<8x32xf32>
    %83 = arith.mulf %81, %82 : vector<8x32xf32>
    %84 = vector.broadcast %65 : vector<1x32xf32> to vector<8x32xf32>
    %85 = arith.addf %83, %84 : vector<8x32xf32>
    %86 = arith.truncf %85 : vector<8x32xf32> to vector<8x32xbf16>
    %c0_33 = arith.constant 0 : index
    %c0_34 = arith.constant 0 : index
    %87 = vector.load %arg9[%c0_33, %c0_34] : memref<32x64xbf16, #tpu.memory_space<vmem>>, vector<32x64xbf16>
    %cst_35 = arith.constant dense<0.000000e+00> : vector<8x64xf32>
    %88 = tpu.matmul %86, %87, %cst_35 {dimension_numbers = #tpu.dot_dimension_numbers<[1], [0], [0], [1], [0, 0, 1, 1], [], []>} : vector<8x32xbf16>, vector<32x64xbf16>, vector<8x64xf32> -> vector<8x64xf32>
    %c0_36 = arith.constant 0 : index
    %c0_37 = arith.constant 0 : index
    %89 = vector.load %arg10[%c0_36, %c0_37] : memref<1x64xf32, #tpu.memory_space<vmem>>, vector<1x64xf32>
    %90 = vector.broadcast %89 : vector<1x64xf32> to vector<8x64xf32>
    %91 = arith.addf %88, %90 : vector<8x64xf32>
    %cst_38 = arith.constant 5.000000e-01 : f32
    %92 = vector.broadcast %cst_38 : f32 to vector<8x64xf32>
    %93 = arith.mulf %92, %91 : vector<8x64xf32>
    %cst_39 = arith.constant 4.471500e-02 : f32
    %94 = vector.broadcast %cst_39 : f32 to vector<8x64xf32>
    %95 = arith.mulf %94, %91 : vector<8x64xf32>
    %96 = arith.mulf %95, %91 : vector<8x64xf32>
    %97 = arith.mulf %96, %91 : vector<8x64xf32>
    %98 = arith.addf %91, %97 : vector<8x64xf32>
    %cst_40 = arith.constant 0.797884583 : f32
    %99 = vector.broadcast %cst_40 : f32 to vector<8x64xf32>
    %100 = arith.mulf %99, %98 : vector<8x64xf32>
    %101 = math.tanh %100 : vector<8x64xf32>
    %cst_41 = arith.constant 1.000000e+00 : f32
    %102 = vector.broadcast %cst_41 : f32 to vector<8x64xf32>
    %103 = arith.addf %102, %101 : vector<8x64xf32>
    %104 = arith.mulf %93, %103 : vector<8x64xf32>
    %105 = arith.truncf %104 : vector<8x64xf32> to vector<8x64xbf16>
    %c0_42 = arith.constant 0 : index
    %c0_43 = arith.constant 0 : index
    %106 = vector.load %arg11[%c0_42, %c0_43] : memref<64x32xbf16, #tpu.memory_space<vmem>>, vector<64x32xbf16>
    %cst_44 = arith.constant dense<0.000000e+00> : vector<8x32xf32>
    %107 = tpu.matmul %105, %106, %cst_44 {dimension_numbers = #tpu.dot_dimension_numbers<[1], [0], [0], [1], [0, 0, 1, 1], [], []>} : vector<8x64xbf16>, vector<64x32xbf16>, vector<8x32xf32> -> vector<8x32xf32>
    %c0_45 = arith.constant 0 : index
    %c0_46 = arith.constant 0 : index
    %108 = vector.load %arg12[%c0_45, %c0_46] : memref<1x32xf32, #tpu.memory_space<vmem>>, vector<1x32xf32>
    %109 = vector.broadcast %108 : vector<1x32xf32> to vector<8x32xf32>
    %110 = arith.addf %107, %109 : vector<8x32xf32>
    %111 = arith.addf %110, %85 : vector<8x32xf32>
    %c0_47 = arith.constant 0 : index
    %c0_48 = arith.constant 0 : index
    %112 = vector.load %arg13[%c0_47, %c0_48] : memref<1x32xf32, #tpu.memory_space<vmem>>, vector<1x32xf32>
    %c0_49 = arith.constant 0 : index
    %c0_50 = arith.constant 0 : index
    %113 = vector.load %arg14[%c0_49, %c0_50] : memref<1x32xf32, #tpu.memory_space<vmem>>, vector<1x32xf32>
    %cst_51 = arith.constant dense<0.000000e+00> : vector<8xf32>
    %114 = vector.multi_reduction <add>, %111, %cst_51 [1] : vector<8x32xf32> to vector<8xf32>
    %115 = vector.shape_cast %114 : vector<8xf32> to vector<8x1xf32>
    %cst_52 = arith.constant 3.200000e+01 : f32
    %116 = vector.broadcast %cst_52 : f32 to vector<8x1xf32>
    %117 = arith.divf %115, %116 : vector<8x1xf32>
    %118 = vector.broadcast %117 : vector<8x1xf32> to vector<8x32xf32>
    %119 = arith.subf %111, %118 : vector<8x32xf32>
    %120 = arith.mulf %119, %119 : vector<8x32xf32>
    %cst_53 = arith.constant dense<0.000000e+00> : vector<8xf32>
    %121 = vector.multi_reduction <add>, %120, %cst_53 [1] : vector<8x32xf32> to vector<8xf32>
    %122 = vector.shape_cast %121 : vector<8xf32> to vector<8x1xf32>
    %cst_54 = arith.constant 3.200000e+01 : f32
    %123 = vector.broadcast %cst_54 : f32 to vector<8x1xf32>
    %124 = arith.divf %122, %123 : vector<8x1xf32>
    %cst_55 = arith.constant 9.99999996E-13 : f32
    %125 = vector.broadcast %cst_55 : f32 to vector<8x1xf32>
    %126 = arith.addf %124, %125 : vector<8x1xf32>
    %127 = math.rsqrt %126 : vector<8x1xf32>
    %128 = vector.broadcast %127 : vector<8x1xf32> to vector<8x32xf32>
    %129 = arith.mulf %119, %128 : vector<8x32xf32>
    %130 = vector.broadcast %112 : vector<1x32xf32> to vector<8x32xf32>
    %131 = arith.mulf %129, %130 : vector<8x32xf32>
    %132 = vector.broadcast %113 : vector<1x32xf32> to vector<8x32xf32>
    %133 = arith.addf %131, %132 : vector<8x32xf32>
    %c0_56 = arith.constant 0 : index
    %c0_57 = arith.constant 0 : index
    %134 = vector.load %arg15[%c0_56, %c0_57] : memref<8x32xf32, #tpu.memory_space<vmem>>, vector<8x32xf32>
    tpu.vector_store %arg15[%c0_56, %c0_57], %133 {strides = array<i32>} : memref<8x32xf32, #tpu.memory_space<vmem>>, vector<8x32xf32>,
    return
  }
  func.func @transform_0(%arg0: i32) -> (i32, i32) {
    %c0_i32 = arith.constant 0 : i32
    %c0_i32_0 = arith.constant 0 : i32
    return %arg0, %c0_i32 : i32, i32
  }
  func.func @transform_1(%arg0: i32) -> (i32, i32, i32) {
    %c0_i32 = arith.constant 0 : i32
    %c0_i32_0 = arith.constant 0 : i32
    %c0_i32_1 = arith.constant 0 : i32
    return %arg0, %c0_i32, %c0_i32_0 : i32, i32, i32
  }
  func.func @transform_2(%arg0: i32) -> (i32, i32) {
    %c0_i32 = arith.constant 0 : i32
    %c0_i32_0 = arith.constant 0 : i32
    %c0_i32_1 = arith.constant 0 : i32
    return %c0_i32, %c0_i32_0 : i32, i32
  }
  func.func @transform_3(%arg0: i32) -> (i32, i32) {
    %c0_i32 = arith.constant 0 : i32
    %c0_i32_0 = arith.constant 0 : i32
    %c0_i32_1 = arith.constant 0 : i32
    return %c0_i32, %c0_i32_0 : i32, i32
  }
  func.func @transform_4(%arg0: i32) -> (i32, i32) {
    %c0_i32 = arith.constant 0 : i32
    %c0_i32_0 = arith.constant 0 : i32
    %c0_i32_1 = arith.constant 0 : i32
    return %c0_i32, %c0_i32_0 : i32, i32
  }
  func.func @transform_5(%arg0: i32) -> (i32, i32) {
    %c0_i32 = arith.constant 0 : i32
    %c0_i32_0 = arith.constant 0 : i32
    %c0_i32_1 = arith.constant 0 : i32
    return %c0_i32, %c0_i32_0 : i32, i32
  }
  func.func @transform_6(%arg0: i32) -> (i32, i32) {
    %c0_i32 = arith.constant 0 : i32
    %c0_i32_0 = arith.constant 0 : i32
    %c0_i32_1 = arith.constant 0 : i32
    return %c0_i32, %c0_i32_0 : i32, i32
  }
  func.func @transform_7(%arg0: i32) -> (i32, i32) {
    %c0_i32 = arith.constant 0 : i32
    %c0_i32_0 = arith.constant 0 : i32
    %c0_i32_1 = arith.constant 0 : i32
    return %c0_i32, %c0_i32_0 : i32, i32
  }
  func.func @transform_8(%arg0: i32) -> (i32, i32) {
    %c0_i32 = arith.constant 0 : i32
    %c0_i32_0 = arith.constant 0 : i32
    %c0_i32_1 = arith.constant 0 : i32
    return %c0_i32, %c0_i32_0 : i32, i32
  }
  func.func @transform_9(%arg0: i32) -> (i32, i32) {
    %c0_i32 = arith.constant 0 : i32
    %c0_i32_0 = arith.constant 0 : i32
    %c0_i32_1 = arith.constant 0 : i32
    return %c0_i32, %c0_i32_0 : i32, i32
  }
  func.func @transform_10(%arg0: i32) -> (i32, i32) {
    %c0_i32 = arith.constant 0 : i32
    %c0_i32_0 = arith.constant 0 : i32
    %c0_i32_1 = arith.constant 0 : i32
    return %c0_i32, %c0_i32_0 : i32, i32
  }
  func.func @transform_11(%arg0: i32) -> (i32, i32) {
    %c0_i32 = arith.constant 0 : i32
    %c0_i32_0 = arith.constant 0 : i32
    %c0_i32_1 = arith.constant 0 : i32
    return %c0_i32, %c0_i32_0 : i32, i32
  }
  func.func @transform_12(%arg0: i32) -> (i32, i32) {
    %c0_i32 = arith.constant 0 : i32
    %c0_i32_0 = arith.constant 0 : i32
    %c0_i32_1 = arith.constant 0 : i32
    return %c0_i32, %c0_i32_0 : i32, i32
  }
  func.func @transform_13(%arg0: i32) -> (i32, i32) {
    %c0_i32 = arith.constant 0 : i32
    %c0_i32_0 = arith.constant 0 : i32
    %c0_i32_1 = arith.constant 0 : i32
    return %c0_i32, %c0_i32_0 : i32, i32
  }
  func.func @transform_14(%arg0: i32) -> (i32, i32) {
    %c0_i32 = arith.constant 0 : i32
    %c0_i32_0 = arith.constant 0 : i32
    return %arg0, %c0_i32 : i32, i32
  }
}

module attributes {stable_mosaic.version = 11 : i64} {
  func.func @_pooler_head_kernel(%arg0: i32, %arg1: memref<2x32xf32, #tpu.memory_space<vmem>>, %arg2: memref<32x32xbf16, #tpu.memory_space<vmem>>, %arg3: memref<1x32xf32, #tpu.memory_space<vmem>>, %arg4: memref<32x1xbf16, #tpu.memory_space<vmem>>, %arg5: memref<1x1xf32, #tpu.memory_space<vmem>>, %arg6: memref<2x1xf32, #tpu.memory_space<vmem>>) attributes {dimension_semantics = [#tpu.dimension_semantics<arbitrary>], iteration_bounds = array<i64: 1>, scalar_prefetch = 0 : i64, scratch_operands = 0 : i64, tpu.core_type = #tpu.core_type<tc>, window_params = [{pipeline_mode = #tpu.pipeline_mode<synchronous>, transform_indices = @transform_0, window_bounds = array<i64: 2, 32>}, {pipeline_mode = #tpu.pipeline_mode<synchronous>, transform_indices = @transform_1, window_bounds = array<i64: 32, 32>}, {pipeline_mode = #tpu.pipeline_mode<synchronous>, transform_indices = @transform_2, window_bounds = array<i64: 1, 32>}, {pipeline_mode = #tpu.pipeline_mode<synchronous>, transform_indices = @transform_3, window_bounds = array<i64: 32, 1>}, {pipeline_mode = #tpu.pipeline_mode<synchronous>, transform_indices = @transform_4, window_bounds = array<i64: 1, 1>}, {pipeline_mode = #tpu.pipeline_mode<synchronous>, transform_indices = @transform_5, window_bounds = array<i64: 2, 1>}]} {
    %c0 = arith.constant 0 : index
    %c0_0 = arith.constant 0 : index
    %0 = vector.load %arg1[%c0, %c0_0] : memref<2x32xf32, #tpu.memory_space<vmem>>, vector<2x32xf32>
    %1 = arith.truncf %0 : vector<2x32xf32> to vector<2x32xbf16>
    %c0_1 = arith.constant 0 : index
    %c0_2 = arith.constant 0 : index
    %2 = vector.load %arg2[%c0_1, %c0_2] : memref<32x32xbf16, #tpu.memory_space<vmem>>, vector<32x32xbf16>
    %cst = arith.constant dense<0.000000e+00> : vector<2x32xf32>
    %3 = tpu.matmul %1, %2, %cst {dimension_numbers = #tpu.dot_dimension_numbers<[1], [0], [0], [1], [0, 0, 1, 1], [], []>} : vector<2x32xbf16>, vector<32x32xbf16>, vector<2x32xf32> -> vector<2x32xf32>
    %c0_3 = arith.constant 0 : index
    %c0_4 = arith.constant 0 : index
    %4 = vector.load %arg3[%c0_3, %c0_4] : memref<1x32xf32, #tpu.memory_space<vmem>>, vector<1x32xf32>
    %5 = vector.broadcast %4 : vector<1x32xf32> to vector<2x32xf32>
    %6 = arith.addf %3, %5 : vector<2x32xf32>
    %7 = math.tanh %6 : vector<2x32xf32>
    %8 = arith.truncf %7 : vector<2x32xf32> to vector<2x32xbf16>
    %c0_5 = arith.constant 0 : index
    %c0_6 = arith.constant 0 : index
    %9 = vector.load %arg4[%c0_5, %c0_6] : memref<32x1xbf16, #tpu.memory_space<vmem>>, vector<32x1xbf16>
    %cst_7 = arith.constant dense<0.000000e+00> : vector<2x1xf32>
    %10 = tpu.matmul %8, %9, %cst_7 {dimension_numbers = #tpu.dot_dimension_numbers<[1], [0], [0], [1], [0, 0, 1, 1], [], []>} : vector<2x32xbf16>, vector<32x1xbf16>, vector<2x1xf32> -> vector<2x1xf32>
    %c0_8 = arith.constant 0 : index
    %c0_9 = arith.constant 0 : index
    %11 = vector.load %arg5[%c0_8, %c0_9] : memref<1x1xf32, #tpu.memory_space<vmem>>, vector<1x1xf32>
    %12 = vector.broadcast %11 : vector<1x1xf32> to vector<2x1xf32>
    %13 = arith.addf %10, %12 : vector<2x1xf32>
    %14 = math.absf %13 : vector<2x1xf32>
    %cst_10 = arith.constant 0.000000e+00 : f32
    %15 = vector.broadcast %cst_10 : f32 to vector<2x1xf32>
    %16 = arith.subf %15, %14 : vector<2x1xf32>
    %17 = math.exp %16 : vector<2x1xf32>
    %cst_11 = arith.constant 0.000000e+00 : f32
    %18 = vector.broadcast %cst_11 : f32 to vector<2x1xf32>
    %19 = arith.cmpf oge, %13, %18 : vector<2x1xf32>
    %cst_12 = arith.constant 1.000000e+00 : f32
    %20 = vector.broadcast %cst_12 : f32 to vector<2x1xf32>
    %21 = arith.addf %20, %17 : vector<2x1xf32>
    %cst_13 = arith.constant 1.000000e+00 : f32
    %22 = vector.broadcast %cst_13 : f32 to vector<2x1xf32>
    %23 = arith.divf %22, %21 : vector<2x1xf32>
    %cst_14 = arith.constant 1.000000e+00 : f32
    %24 = vector.broadcast %cst_14 : f32 to vector<2x1xf32>
    %25 = arith.addf %24, %17 : vector<2x1xf32>
    %26 = arith.divf %17, %25 : vector<2x1xf32>
    %27 = arith.select %19, %23, %26 : vector<2x1xi1>, vector<2x1xf32>
    %c0_15 = arith.constant 0 : index
    %c0_16 = arith.constant 0 : index
    %28 = vector.load %arg6[%c0_15, %c0_16] : memref<2x1xf32, #tpu.memory_space<vmem>>, vector<2x1xf32>
    tpu.vector_store %arg6[%c0_15, %c0_16], %27 {strides = array<i32>} : memref<2x1xf32, #tpu.memory_space<vmem>>, vector<2x1xf32>,
    return
  }
  func.func @transform_0(%arg0: i32) -> (i32, i32) {
    %c0_i32 = arith.constant 0 : i32
    %c0_i32_0 = arith.constant 0 : i32
    %c0_i32_1 = arith.constant 0 : i32
    return %c0_i32, %c0_i32_0 : i32, i32
  }
  func.func @transform_1(%arg0: i32) -> (i32, i32) {
    %c0_i32 = arith.constant 0 : i32
    %c0_i32_0 = arith.constant 0 : i32
    %c0_i32_1 = arith.constant 0 : i32
    return %c0_i32, %c0_i32_0 : i32, i32
  }
  func.func @transform_2(%arg0: i32) -> (i32, i32) {
    %c0_i32 = arith.constant 0 : i32
    %c0_i32_0 = arith.constant 0 : i32
    %c0_i32_1 = arith.constant 0 : i32
    return %c0_i32, %c0_i32_0 : i32, i32
  }
  func.func @transform_3(%arg0: i32) -> (i32, i32) {
    %c0_i32 = arith.constant 0 : i32
    %c0_i32_0 = arith.constant 0 : i32
    %c0_i32_1 = arith.constant 0 : i32
    return %c0_i32, %c0_i32_0 : i32, i32
  }
  func.func @transform_4(%arg0: i32) -> (i32, i32) {
    %c0_i32 = arith.constant 0 : i32
    %c0_i32_0 = arith.constant 0 : i32
    %c0_i32_1 = arith.constant 0 : i32
    return %c0_i32, %c0_i32_0 : i32, i32
  }
  func.func @transform_5(%arg0: i32) -> (i32, i32) {
    %c0_i32 = arith.constant 0 : i32
    %c0_i32_0 = arith.constant 0 : i32
    %c0_i32_1 = arith.constant 0 : i32
    return %c0_i32, %c0_i32_0 : i32, i32
  }
}

</mosaic_0001>

<bundles_post_ra>
// kernel: bert_classifier_forward.4
= control target key start
LH: loop header
LB: loop body
LE: loop exit
PB: predicated region body
PF: predicated region fallthrough
CT: control target
= control target key end

     0   :  { %vm18_vm0 = vcmask 261120   ;;  %s118_s0 = inlined_call_operand.vmem [shape: f32[16,32], index: 0, kind: input, shape index: {}]   ;;  %s119_s1 = inlined_call_operand.vmem [shape: f32[1,32], index: 1, kind: input, shape index: {}]   ;;  %s120_s2 = inlined_call_operand.vmem [shape: f32[1,32], index: 2, kind: input, shape index: {}]   ;;  %s121_s3 = inlined_call_operand.vmem [shape: f32[16,32], index: 3, kind: output, shape index: {}]  }
   0x1   :  { %v14_v0 = vld [vmem:[%s118_s0] sm:$0xff]  ;;  %v15_v1 = vld [vmem:[%s118_s0 + $0x8] sm:$0xff] }
   0x2   :  { %v19_v2 = vsel %vm18_vm0, %v14_v0, 0.0  ;;  %v22_v3 = vsel %vm18_vm0, %v15_v1, 0.0  ;;  %v68_v21 = vld [vmem:[%s119_s1] ss:$0 sm:$0xff] }
   0x3   :  { %20 = vadd.xlane.f32.xlu0 %v19_v2  ;;  %v69_v23 = vld [vmem:[%s120_s2] ss:$0 sm:$0xff] }
   0x7   :  { %23 = vadd.xlane.f32.xlu0 %v22_v3 }
  0x90   :  { %v21_v4 = vpop.xlane.xlu0 %20 }
  0x91   :  { %v26_v5 = vmul.f32 0.03125, %v21_v4 }
  0x93   :  { %v28_v6 = vsub.f32 %v14_v0, %v26_v5 }
  0x94   :  { %v24_v7 = vpop.xlane.xlu0 %23 }
  0x95   :  { %v27_v8 = vmul.f32 0.03125, %v24_v7  ;;  %v30_v9 = vmul.f32 %v28_v6, %v28_v6 }
  0x97   :  { %v29_v10 = vsub.f32 %v15_v1, %v27_v8  ;;  %v32_v11 = vsel %vm18_vm0, %v30_v9, 0.0 }
  0x98   :  { %33 = vadd.xlane.f32.xlu1 %v32_v11 }
  0x99   :  { %v31_v12 = vmul.f32 %v29_v10, %v29_v10 }
  0x9b   :  { %v35_v13 = vsel %vm18_vm0, %v31_v12, 0.0 }
  0x9c   :  { %36 = vadd.xlane.f32.xlu1 %v35_v13 }
 0x125   :  { %v34_v14 = vpop.xlane.xlu1 %33 }
 0x126   :  { %v38_v15 = vmul.f32 0.03125, %v34_v14 }
 0x128   :  { %v40_v16 = vadd.f32 1e-12, %v38_v15 }
 0x129   :  { %v37_v17 = vpop.xlane.xlu1 %36 }
 0x12a   :  { %70 = vrsqrt.f32 %v40_v16  ;;  %v39_v18 = vmul.f32 0.03125, %v37_v17 }
 0x12c   :  { %v41_v19 = vadd.f32 1e-12, %v39_v18 }
 0x12e   :  { %72 = vrsqrt.f32 %v41_v19 }
 0x134   :  { %v71_v20 = vpop.eup %70 }
 0x135   :  { %v44_v22 = vmul.f32 %v71_v20, %v28_v6 }
 0x137   :  { %v52_v24 = vmul.f32 %v68_v21, %v44_v22 }
 0x138   :  { %v73_v25 = vpop.eup %72 }
 0x139   :  { %v60_v26 = vadd.f32 %v69_v23, %v52_v24  ;;  %v45_v27 = vmul.f32 %v73_v25, %v29_v10 }
 0x13b   :  { %62 = vst.msk [vmem:[%s121_s3] sm:$0xff] %vm18_vm0, %v60_v26  ;;  %v53_v28 = vmul.f32 %v68_v21, %v45_v27 }
 0x13d   :  { %v61_v29 = vadd.f32 %v69_v23, %v53_v28 }
 0x13f   :  { %63 = vst.msk [vmem:[%s121_s3 + $0x8] sm:$0xff] %vm18_vm0, %v61_v29 }

// kernel: bert_classifier_forward.7
= control target key start
LH: loop header
LB: loop body
LE: loop exit
PB: predicated region body
PF: predicated region fallthrough
CT: control target
= control target key end

     0   :  { %v218_v0 = vmov 0.0   ;;  %vm219_vm0 = vmmov 0   ;;  %vm48_vm1 = vcmask 261120   ;;  %vm170_vm2 = vcmask 1024   ;;  %s276_s1 = inlined_call_operand.vmem [shape: bf16[32,32], index: 1, kind: input, shape index: {}]   ;;  %s277_s0 = inlined_call_operand.vmem [shape: f32[2,32], index: 0, kind: input, shape index: {}]   ;;  %s278_s3 = inlined_call_operand.vmem [shape: bf16[32,1], index: 3, kind: input, shape index: {}]   ;;  %s279_s4 = inlined_call_operand.<no memory space> [shape: f32[1,1], index: 4, kind: input, shape index: {}]   ;;  %s280_s2 = inlined_call_operand.vmem [shape: f32[1,32], index: 2, kind: input, shape index: {}]   ;;  %s281_s5 = inlined_call_operand.vmem [shape: f32[2,1], index: 5, kind: output, shape index: {}]  }
   0x1   :  { %190 = vmatprep.subr.bf16.mxu0 %v218_v0  ;;  %v208_v1 = vld [vmem:[%s276_s1] sm:$0xff]   ;;  %194 = vmatprep.mubr.msk.bf16.mxu0 %vm219_vm0, %v218_v0  ;;  %v209_v2 = vld [vmem:[%s276_s1 + $0x8] sm:$0xff]   ;;  %v10_v7 = vstv %s279_s4 }
   0x2   :  { %198 = vmatprep.subr.bf16.mxu1 %v218_v0  ;;  %202 = vmatprep.mubr.msk.bf16.mxu1 %vm219_vm0, %v218_v0  ;;  %v23_v3 = vld [vmem:[%s277_s0] sm:$0x3]  ;;  %v211_v6 = vld [vmem:[%s278_s3 + $0x8] sm:$0xff]   ;;  %11 = vst [vmem:[#allocation2] sm:$0x1] %v10_v7 }
   0x3   :  { %191 = vmatpush3.bf16.msra.mxu0 %v208_v1  ;;  %v24_v4 = vpack.c.bf16 %v23_v3, %v23_v3  ;;  %v210_v5 = vld [vmem:[%s278_s3] sm:$0xff]  }
   0x4   :  { %192 = vmatprep.subr.bf16.mxu0 %v218_v0  ;;  %199 = vmatpush3.bf16.msra.mxu1 %v210_v5  ;;  %v176_v8 = vld [vmem:[%s280_s2] ss:$0 sm:$0xff] }
   0x5   :  { %200 = vmatprep.subr.bf16.mxu1 %v218_v0 }
   0x7   :  { %193 = vmatpush3.bf16.msra.mxu0 %v209_v2 }
   0x8   :  { %201 = vmatpush3.bf16.msra.mxu1 %v211_v6 }
   0x9   :  { %v180_v16 = vld [vmem:[#allocation2] ss:$0 sm:$0xff] }
   0xa   :  { %195 = vmatmul.mubr.msk.bf16.vlgmr.msra.gmra.mrb[0].mxu0 %vm48_vm1, %v24_v4 }
  0xdd   :  { %v86_v9 = vpop.f32.mrb[0].mxu0 }
  0xde   :  { %v87_v10 = vadd.f32 %v176_v8, %v86_v9  ;;  %v196_v11 = vpop.f32.mrb[1].mxu0 }
  0xdf   :  { %v89_v12 = vpop.f32.mrb[2].mxu0 }
  0xe0   :  { %212 = vtanh.f32 %v87_v10  ;;  %v197_v13 = vpop.f32.mrb[3].mxu0 }
  0xea   :  { %v213_v14 = vpop.eup %212 }
  0xeb   :  { %v93_v15 = vpack.c.bf16 %v213_v14, %v213_v14 }
  0xed   :  { %203 = vmatmul.mubr.msk.bf16.vlgmr.msra.gmra.mrb[0].mxu1 %vm48_vm1, %v93_v15 }
 0x1c0   :  { %v154_v17 = vpop.f32.mrb[0].mxu1 }
 0x1c1   :  { %v155_v18 = vadd.f32 %v180_v16, %v154_v17  ;;  %v204_v19 = vpop.f32.mrb[1].mxu1 }
 0x1c2   :  { %v157_v20 = vpop.f32.mrb[2].mxu1 }
 0x1c3   :  { %v160_v21 = vand.u32 2147483647, %v155_v18  ;;  %v205_v22 = vpop.f32.mrb[3].mxu1  ;;  %vm164_vm3 = vcmp.ge.f32.partialorder %v155_v18, 0.0 }
 0x1c5   :  { %v161_v23 = vsub.f32 0.0, %v160_v21 }
 0x1c7   :  { %v162_v24 = vmul.f32 1.442695, %v161_v23 }
 0x1c9   :  { %214 = vpow2.f32 %v162_v24 }
 0x1d3   :  { %v215_v25 = vpop.eup %214 }
 0x1d4   :  { %v165_v26 = vadd.f32 1.0, %v215_v25 }
 0x1d6   :  { %216 = vrcp.f32 %v165_v26 }
 0x1e0   :  { %v217_v27 = vpop.eup %216 }
 0x1e1   :  { %v168_v28 = vmul.f32 %v217_v27, %v215_v25 }
 0x1e3   :  { %v169_v29 = vsel %vm164_vm3, %v217_v27, %v168_v28 }
 0x1e4   :  { %171 = vst.msk [vmem:[%s281_s5] sm:$0x3] %vm170_vm2, %v169_v29 }

// kernel: bert_classifier_forward.5
= control target key start
LH: loop header
LB: loop body
LE: loop exit
PB: predicated region body
PF: predicated region fallthrough
CT: control target
= control target key end

     0   :  { %s1426_s29 = smov 0   ;;  %s1564_s0 = inlined_call_operand.vmem [shape: f32[16,32], index: 0, kind: input, shape index: {}]   ;;  %s1565_s1 = inlined_call_operand.vmem [shape: f32[2,1,8], index: 1, kind: input, shape index: {}]   ;;  %s1566_s2 = inlined_call_operand.vmem [shape: bf16[32,96], index: 2, kind: input, shape index: {}]   ;;  %s1567_s3 = inlined_call_operand.vmem [shape: f32[1,96], index: 3, kind: input, shape index: {}]   ;;  %s1568_s4 = inlined_call_operand.vmem [shape: bf16[32,32], index: 4, kind: input, shape index: {}]   ;;  %s1569_s5 = inlined_call_operand.vmem [shape: f32[1,32], index: 5, kind: input, shape index: {}]   ;;  %s1570_s6 = inlined_call_operand.vmem [shape: f32[1,32], index: 6, kind: input, shape index: {}]   ;;  %s1571_s7 = inlined_call_operand.vmem [shape: f32[1,32], index: 7, kind: input, shape index: {}]   ;;  %s1572_s8 = inlined_call_operand.vmem [shape: bf16[32,64], index: 8, kind: input, shape index: {}]   ;;  %s1573_s9 = inlined_call_operand.vmem [shape: f32[1,64], index: 9, kind: input, shape index: {}]   ;;  %s1574_s10 = inlined_call_operand.vmem [shape: bf16[64,32], index: 10, kind: input, shape index: {}]   ;;  %s1575_s11 = inlined_call_operand.vmem [shape: f32[1,32], index: 11, kind: input, shape index: {}]   ;;  %s1576_s12 = inlined_call_operand.vmem [shape: f32[1,32], index: 12, kind: input, shape index: {}]   ;;  %s1577_s13 = inlined_call_operand.vmem [shape: f32[1,32], index: 13, kind: input, shape index: {}]   ;;  %s1578_s14 = inlined_call_operand.vmem [shape: f32[16,32], index: 14, kind: output, shape index: {}]  }
   0x1 LB: > { %s1173_s30 = sadd.s32 4294967295, %s1342_s29   ;;  %p1177_p0 = scmp.ge.s32.totalorder %s1342_s29, 1  ;;  %s1342_s29 = sphi %s1426_s29, %s24_s29  }
   0x2   : > { %p419_p1 = scmp.lt.s32.totalorder %s1342_s29, 3 }
   0x4   : > { %p420_p2 = pnand %p1177_p0, %p419_p1 }
   0x5   : > { %v1312_v0 = vld [vmem:[%s1566_s2] sm:$0xff] (!%p420_p2)   ;;  %v1344_v1 = vmov (!%p420_p2), 0.0   ;;  %v1313_v2 = vld [vmem:[%s1566_s2 + $0x8] sm:$0xff] (!%p420_p2)   ;;  %vm1345_vm0 = vmmov (!%p420_p2), 0   ;;  %p466_p3 = scmp.lt.s32.totalorder (!%p420_p2), %s1173_s30, 1  ;;  %vm504_vm1 = vcmask (!%p420_p2), 261120  }
   0x6   : > { %423 = sbr.rel (%p420_p2) target bundleno = 2414 (0x96e), region = 76  ;;  %1233 = vmatprep.subr.bf16.mxu1 (!%p420_p2), %v1344_v1  ;;  %1247 = vmatprep.subr.bf16.mxu0 (!%p420_p2), %v1344_v1  ;;  %v1180_v5 = vld [vmem:[%s1567_s3] ss:$0 sm:$0xff] (!%p420_p2)  ;;  %s1346_s25 = smov (!%p420_p2), 112   ;;  %vm558_vm2 = vcmask (!%p420_p2), 130048   ;;  %vm605_vm3 = vcmask (!%p420_p2), 64512  }
   0x7   : > { %1234 = vmatpush3.bf16.msra.mxu1 (!%p420_p2), %v1312_v0  ;;  %1237 = vmatprep.mubr.msk.bf16.mxu1 (!%p420_p2), %vm1345_vm0, %v1344_v1  ;;  %s1347_s26 = smov (!%p420_p2), 96   ;;  %s1348_s27 = smov (!%p420_p2), 80   ;;  %vm623_vm4 = vcmask (!%p420_p2), 1043456   ;;  %v1314_v52 = vld [vmem:[%s1568_s4] sm:$0xff] (!%p420_p2)   ;;  %v1315_v53 = vld [vmem:[%s1568_s4 + $0x8] sm:$0xff] (!%p420_p2)   ;;  %vm1036_vm5 = vcmask (!%p420_p2), 523264  }
   0x8   : > { %1235 = vmatprep.subr.bf16.mxu1 (!%p420_p2), %v1344_v1  ;;  %1249 = vmatprep.mubr.msk.bf16.mxu0 (!%p420_p2), %vm1345_vm0, %v1344_v1  ;;  %s1349_s17 = smov (!%p420_p2), 64   ;;  %s1350_s18 = smov (!%p420_p2), 48  }
   0xb   : > { %1236 = vmatpush3.bf16.msra.mxu1 (!%p420_p2), %v1313_v2 }
   0xc   : > { %1241 = vmatprep.subr.bf16.mxu1 (!%p420_p2), %v1344_v1 }
   0xd   : > { %s1580_s30 = smov (!%p466_p3, %s1173_s30), 1 }
   0xe   : > { %s1178_s19 = sshll.u32 %s1580_s30, 3  ;;  %s472_s16 = scalar_lea.vmem %s1565_s1, %s1580_s30 }
   0xf   : > { %s469_s22 = scalar_lea.vmem %s1564_s0, %s1178_s19  ;;  %v1184_v17 = vld [vmem:[%s472_s16] ss:$0 sm:$0xff] }
  0x10   : > { %v1456_v3 = vld [vmem:[%s469_s22] sm:$0xff] }
  0x11   : > { %v480_v4 = vpack.c.bf16 %v1456_v3, %v1456_v3 }
  0x13   : > { %1238 = vmatmul.mubr.msk.bf16.vlgmr.msra.gmra.mrb[0].mxu1 %vm504_vm1, %v480_v4 }
  0x14   : > { %1243 = vmatprep.mubr.msk.bf16.mxu1 %vm1345_vm0, %v1344_v1 }
  0xe6   : > { %v542_v6 = vpop.f32.mrb[0].mxu1 }
  0xe7   : > { %v543_v7 = vadd.f32 %v1180_v5, %v542_v6  ;;  %v1239_v8 = vpop.f32.mrb[1].mxu1 }
  0xe8   : > { %v545_v9 = vpop.f32.mrb[2].mxu1 }
  0xe9   : > { %v548_v10 = vpack.c.bf16 %v543_v7, %v543_v7  ;;  %v1240_v11 = vpop.f32.mrb[3].mxu1  ;;  %v1193_v7 = vld [vmem:[%s1569_s5] ss:$0 sm:$0xff] }
  0xeb   : > { %670 = vrot.lane.b32.xlu1 %v548_v10, %s1346_s25  ;;  %556 = vrot.lane.b32.xlu0 %v548_v10, %s1347_s26  ;;  %s476_s26 = scalar_lea.vmem %s1578_s14, %s1178_s19 }
  0xef   : > { %672 = vrot.lane.b32.xlu0 %v548_v10, %s1348_s27 }
 0x15d   : > { %v557_v12 = vpop.permute.xlu0 %556  ;;  %v671_v16 = vpop.permute.xlu1 %670 }
 0x15e   : > { %v563_v13 = vsel %vm558_vm2, %v557_v12, 0 }
 0x15f   : > { %1242 = vmatpush3.bf16.xpose.msra.mxu1 %v563_v13 }
 0x160   : > { %1253 = vmatprep.subr.bf16.mxu1 %v1344_v1 }
 0x161   : > { %v673_v14 = vpop.permute.xlu0 %672 }
 0x162   : > { %v678_v15 = vsel %vm558_vm2, %v673_v14, 0 }
 0x166   : > { %1244 = vmatmul.mubr.msk.bf16.vlgmr.msra.gmra.mrb[4].mxu1 %vm558_vm2, %v548_v10 }
 0x167   : > { %1254 = vmatpush3.bf16.xpose.msra.mxu1 %v678_v15  ;;  %1255 = vmatprep.mubr.msk.bf16.mxu1 %vm1345_vm0, %v1344_v1 }
 0x168   : > { %1265 = vmatprep.subr.bf16.mxu1 %v1344_v1 }
 0x16e   : > { %1256 = vmatmul.mubr.msk.bf16.vlgmr.msra.gmra.mrb[8].mxu1 %vm558_vm2, %v671_v16 }
 0x16f   : > { %1267 = vmatprep.mubr.msk.bf16.mxu1 %vm1345_vm0, %v1344_v1  ;;  %1266 = vmatpush3.bf16.msra.mxu1 %v1315_v53 }
 0x170   : > { %1277 = vmatprep.subr.bf16.mxu1 %v1344_v1 }
 0x239   : > { %v599_v18 = vpop.f32.mrb[4].mxu1 }
 0x23a   : > { %v600_v19 = vadd.f32 %v1184_v17, %v599_v18  ;;  %v1245_v20 = vpop.f32.mrb[5].mxu1 }
 0x23b   : > { %v602_v21 = vpop.f32.mrb[6].mxu1  ;;  %v1316_v20 = vld [vmem:[%s1572_s8] sm:$0xff]  }
 0x23c   : > { %v1246_v22 = vpop.f32.mrb[7].mxu1  ;;  %v606_v23 = vsel %vm605_vm3, %v600_v19, -inf  ;;  %v1317_v21 = vld [vmem:[%s1572_s8 + $0x8] sm:$0xff]  }
 0x23d   : > { %607 = vmax.xlane.f32.xlu1 %v606_v23 }
 0x241   : > { %v714_v24 = vpop.f32.mrb[8].mxu1 }
 0x242   : > { %v715_v25 = vadd.f32 %v1184_v17, %v714_v24  ;;  %v1257_v26 = vpop.f32.mrb[9].mxu1 }
 0x243   : > { %v717_v27 = vpop.f32.mrb[10].mxu1 }
 0x244   : > { %v1258_v28 = vpop.f32.mrb[11].mxu1  ;;  %v720_v29 = vsel %vm605_vm3, %v715_v25, -inf  ;;  %v1195_v27 = vld [vmem:[%s1571_s7] ss:$0 sm:$0xff] }
 0x245   : > { %721 = vmax.xlane.f32.xlu0 %v720_v29 }
 0x2ca   : > { %v608_v30 = vpop.xlane.xlu1 %607 }
 0x2cb   : > { %v609_v31 = vsub.f32 %v600_v19, %v608_v30 }
 0x2cd   : > { %v610_v32 = vmul.f32 1.442695, %v609_v31  ;;  %v1318_v31 = vld [vmem:[%s1574_s10] sm:$0xff]  }
 0x2cf   : > { %1322 = vpow2.f32 %v610_v32  ;;  %v1319_v32 = vld [vmem:[%s1574_s10 + $0x8] sm:$0xff]  }
 0x2d2   : > { %v722_v33 = vpop.xlane.xlu0 %721 }
 0x2d3   : > { %v723_v34 = vsub.f32 %v715_v25, %v722_v33  ;;  %v1194_v25 = vld [vmem:[%s1570_s6] ss:$0 sm:$0xff]  ;;  %v1320_v33 = vld [vmem:[%s1574_s10 + $0x10] sm:$0xff]  }
 0x2d5   : > { %v724_v35 = vmul.f32 1.442695, %v723_v34  ;;  %v1321_v34 = vld [vmem:[%s1574_s10 + $0x18] sm:$0xff]  }
 0x2d7   : > { %1324 = vpow2.f32 %v724_v35  ;;  %v1196_v35 = vld [vmem:[%s1573_s9] ss:$0 sm:$0xff] }
 0x2d9   : > { %v1323_v36 = vpop.eup %1322 }
 0x2da   : > { %v612_v37 = vsel %vm605_vm3, %v1323_v36, 0.0 }
 0x2db   : > { %613 = vadd.xlane.f32.xlu0 %v612_v37 }
 0x2e1   : > { %v1325_v38 = vpop.eup %1324 }
 0x2e2   : > { %v726_v39 = vsel %vm605_vm3, %v1325_v38, 0.0 }
 0x2e3   : > { %727 = vadd.xlane.f32.xlu1 %v726_v39 }
 0x2f1   : > { %618 = vrot.lane.b32.xlu0 %v548_v10, %s1349_s17 }
 0x2f4   : > { %732 = vrot.lane.b32.xlu1 %v548_v10, %s1350_s18 }
 0x368   : > { %v614_v40 = vpop.xlane.xlu0 %613 }
 0x369   : > { %1326 = vrcp.f32 %v614_v40 }
 0x36c   : > { %v619_v41 = vpop.permute.xlu0 %618 }
 0x36d   : > { %v625_v42 = vsel %vm623_vm4, %v619_v41, 0 }
 0x36e   : > { %1248 = vmatpush3.bf16.msra.mxu0 %v625_v42 }
 0x36f   : > { %1259 = vmatprep.subr.bf16.mxu0 %v1344_v1 }
 0x370   : > { %v728_v43 = vpop.xlane.xlu1 %727 }
 0x371   : > { %1328 = vrcp.f32 %v728_v43 }
 0x373   : > { %v1327_v44 = vpop.eup %1326 }
 0x374   : > { %v616_v45 = vmul.f32 %v1327_v44, %v1323_v36  ;;  %v733_v46 = vpop.permute.xlu1 %732 }
 0x375   : > { %v738_v48 = vsel %vm623_vm4, %v733_v46, 0 }
 0x376   : > { %v617_v47 = vpack.c.bf16 %v616_v45, %v616_v45 }
 0x378   : > { %1250 = vmatmul.mubr.msk.bf16.vlgmr.msra.gmra.mrb[0].mxu0 %vm605_vm3, %v617_v47 }
 0x379   : > { %1260 = vmatpush3.bf16.msra.mxu0 %v738_v48  ;;  %1261 = vmatprep.mubr.msk.bf16.mxu0 %vm1345_vm0, %v1344_v1 }
 0x37a   : > { %1271 = vmatprep.subr.bf16.mxu0 %v1344_v1 }
 0x37b   : > { %v1329_v49 = vpop.eup %1328 }
 0x37c   : > { %v730_v50 = vmul.f32 %v1329_v49, %v1325_v38 }
 0x37e   : > { %v731_v51 = vpack.c.bf16 %v730_v50, %v730_v50  ;;  %v1200_v50 = vld [vmem:[%s1575_s11] ss:$0 sm:$0xff] }
 0x380   : > { %1262 = vmatmul.mubr.msk.bf16.vlgmr.msra.gmra.mrb[4].mxu0 %vm605_vm3, %v731_v51 }
 0x381   : > { %1273 = vmatprep.mubr.msk.bf16.mxu0 %vm1345_vm0, %v1344_v1  ;;  %1272 = vmatpush3.bf16.msra.mxu0 %v1314_v52 }
 0x382   : > { %1285 = vmatprep.subr.bf16.mxu0 %v1344_v1 }
 0x44b   : > { %v661_v54 = vpop.f32.mrb[0].mxu0 }
 0x44c   : > { %v667_v55 = vpack.c.bf16 %v661_v54, %v661_v54  ;;  %v1251_v56 = vpop.f32.mrb[1].mxu0 }
 0x44d   : > { %v664_v57 = vpop.f32.mrb[2].mxu0 }
 0x44e   : > { %v1252_v58 = vpop.f32.mrb[3].mxu0  ;;  %1274 = vmatmul.mubr.msk.bf16.vlgmr.msra.gmra.mrb[8].mxu0 %vm558_vm2, %v667_v55 }
 0x44f   : > { %1293 = vmatprep.mubr.msk.bf16.mxu0 %vm1345_vm0, %v1344_v1  ;;  %1286 = vmatpush3.bf16.msra.mxu0 %v1318_v31 }
 0x450   : > { %1287 = vmatprep.subr.bf16.mxu0 %v1344_v1 }
 0x453   : > { %v774_v59 = vpop.f32.mrb[4].mxu0  ;;  %1288 = vmatpush3.bf16.msra.mxu0 %v1319_v32 }
 0x454   : > { %v780_v60 = vpack.c.bf16 %v774_v59, %v774_v59  ;;  %v1263_v61 = vpop.f32.mrb[5].mxu0  ;;  %1289 = vmatprep.subr.bf16.mxu0 %v1344_v1 }
 0x455   : > { %v777_v62 = vpop.f32.mrb[6].mxu0 }
 0x456   : > { %v1264_v63 = vpop.f32.mrb[7].mxu0  ;;  %1268 = vmatmul.mubr.msk.bf16.vlgmr.msra.gmra.mrb[12].mxu1 %vm558_vm2, %v780_v60 }
 0x457   : > { %1281 = vmatprep.mubr.msk.bf16.mxu1 %vm1345_vm0, %v1344_v1  ;;  %1278 = vmatpush3.bf16.msra.mxu1 %v1316_v20 }
 0x458   : > { %1279 = vmatprep.subr.bf16.mxu1 %v1344_v1  ;;  %1290 = vmatpush3.bf16.msra.mxu0 %v1320_v33 }
 0x459   : > { %1291 = vmatprep.subr.bf16.mxu0 %v1344_v1 }
 0x45b   : > { %1280 = vmatpush3.bf16.msra.mxu1 %v1317_v21 }
 0x45c   : > { %1292 = vmatpush3.bf16.msra.mxu0 %v1321_v34 }
 0x521   : > { %v875_v0 = vpop.f32.mrb[8].mxu0 }
 0x522   : > { %v1275_v2 = vpop.f32.mrb[9].mxu0 }
 0x523   : > { %v878_v4 = vpop.f32.mrb[10].mxu0 }
 0x524   : > { %v1276_v5 = vpop.f32.mrb[11].mxu0 }
 0x525   : > { %v1206_v5 = vld [vmem:[%s1576_s12] ss:$0 sm:$0xff] }
 0x529   : > { %v826_v6 = vpop.f32.mrb[12].mxu1 }
 0x52a   : > { %v876_v8 = vadd.f32 %v875_v0, %v826_v6  ;;  %v1269_v9 = vpop.f32.mrb[13].mxu1 }
 0x52b   : > { %v829_v10 = vpop.f32.mrb[14].mxu1 }
 0x52c   : > { %v888_v11 = vadd.f32 %v1193_v7, %v876_v8  ;;  %v1270_v12 = vpop.f32.mrb[15].mxu1  ;;  %v1207_v7 = vld [vmem:[%s1577_s13] ss:$0 sm:$0xff] }
 0x52e   : > { %v889_v13 = vadd.f32 %v888_v11, %v1456_v3 }
 0x530   : > { %v892_v14 = vsel %vm504_vm1, %v889_v13, 0.0 }
 0x531   : > { %893 = vadd.xlane.f32.xlu1 %v892_v14 }
 0x5be   : > { %v894_v15 = vpop.xlane.xlu1 %893 }
 0x5bf   : > { %v896_v16 = vmul.f32 0.03125, %v894_v15 }
 0x5c1   : > { %v897_v17 = vsub.f32 %v889_v13, %v896_v16 }
 0x5c3   : > { %v898_v18 = vmul.f32 %v897_v17, %v897_v17 }
 0x5c5   : > { %v899_v19 = vsel %vm504_vm1, %v898_v18, 0.0 }
 0x5c6   : > { %900 = vadd.xlane.f32.xlu0 %v899_v19 }
 0x653   : > { %v901_v3 = vpop.xlane.xlu0 %900 }
 0x654   : > { %v902_v22 = vmul.f32 0.03125, %v901_v3 }
 0x656   : > { %v903_v23 = vadd.f32 1e-12, %v902_v22 }
 0x658   : > { %1330 = vrsqrt.f32 %v903_v23 }
 0x662   : > { %v1331_v24 = vpop.eup %1330 }
 0x663   : > { %v905_v26 = vmul.f32 %v1331_v24, %v897_v17 }
 0x665   : > { %v912_v28 = vmul.f32 %v1194_v25, %v905_v26 }
 0x667   : > { %v919_v29 = vadd.f32 %v1195_v27, %v912_v28 }
 0x669   : > { %v920_v30 = vpack.c.bf16 %v919_v29, %v919_v29 }
 0x66b   : > { %1282 = vmatmul.mubr.msk.bf16.vlgmr.msra.gmra.mrb[16].mxu1 %vm504_vm1, %v920_v30 }
 0x73e   : > { %v981_v36 = vpop.f32.mrb[16].mxu1 }
 0x73f   : > { %v982_v37 = vadd.f32 %v1196_v35, %v981_v36  ;;  %v1283_v38 = vpop.f32.mrb[17].mxu1 }
 0x740   : > { %v984_v39 = vpop.f32.mrb[18].mxu1 }
 0x741   : > { %v988_v40 = vmul.f32 0.044715, %v982_v37  ;;  %v1284_v41 = vpop.f32.mrb[19].mxu1  ;;  %v987_v47 = vmul.f32 0.5, %v982_v37 }
 0x743   : > { %v989_v42 = vmul.f32 %v988_v40, %v982_v37 }
 0x745   : > { %v990_v43 = vmul.f32 %v989_v42, %v982_v37 }
 0x747   : > { %v991_v44 = vadd.f32 %v990_v43, %v982_v37 }
 0x749   : > { %v992_v45 = vmul.f32 0.7978846, %v991_v44 }
 0x74b   : > { %1332 = vtanh.f32 %v992_v45 }
 0x755   : > { %v1333_v46 = vpop.eup %1332 }
 0x756   : > { %v994_v48 = vadd.f32 1.0, %v1333_v46 }
 0x758   : > { %v995_v1 = vmul.f32 %v994_v48, %v987_v47 }
 0x75a   : > { %v996_v49 = vpack.c.bf16 %v995_v1, %v995_v1 }
 0x75c   : > { %1294 = vmatmul.mubr.msk.bf16.vlgmr.msra.gmra.mrb[12].mxu0 %vm1036_vm5, %v996_v49 }
 0x82f   : > { %v1074_v51 = vpop.f32.mrb[12].mxu0 }
 0x830   : > { %v1075_v52 = vadd.f32 %v1200_v50, %v1074_v51  ;;  %v1295_v53 = vpop.f32.mrb[13].mxu0 }
 0x831   : > { %v1077_v54 = vpop.f32.mrb[14].mxu0 }
 0x832   : > { %v1296_v55 = vpop.f32.mrb[15].mxu0  ;;  %v1080_v56 = vadd.f32 %v1075_v52, %v919_v29 }
 0x834   : > { %v1083_v57 = vsel %vm504_vm1, %v1080_v56, 0.0 }
 0x835   : > { %1084 = vadd.xlane.f32.xlu0 %v1083_v57 }
 0x8c2   : > { %v1085_v58 = vpop.xlane.xlu0 %1084 }
 0x8c3   : > { %v1086_v59 = vmul.f32 0.03125, %v1085_v58 }
 0x8c5   : > { %v1087_v60 = vsub.f32 %v1080_v56, %v1086_v59 }
 0x8c7   : > { %v1088_v61 = vmul.f32 %v1087_v60, %v1087_v60 }
 0x8c9   : > { %v1089_v62 = vsel %vm504_vm1, %v1088_v61, 0.0 }
 0x8ca   : > { %1090 = vadd.xlane.f32.xlu1 %v1089_v62 }
 0x957   : > { %v1091_v63 = vpop.xlane.xlu1 %1090 }
 0x958   : > { %v1092_v0 = vmul.f32 0.03125, %v1091_v63 }
 0x95a   : > { %v1093_v2 = vadd.f32 1e-12, %v1092_v0 }
 0x95c   : > { %1334 = vrsqrt.f32 %v1093_v2 }
 0x966   : > { %v1335_v4 = vpop.eup %1334 }
 0x967   : > { %v1095_v6 = vmul.f32 %v1335_v4, %v1087_v60 }
 0x969   : > { %v1102_v8 = vmul.f32 %v1206_v5, %v1095_v6 }
 0x96b   : > { %v1109_v9 = vadd.f32 %v1207_v7, %v1102_v8 }
 0x96d   : > { %1110 = vst.msk [vmem:[%s476_s26] sm:$0xff] %vm504_vm1, %v1109_v9 }
 0x96e PF: > { %s24_s29 = sadd.s32 1, %s1342_s29  }
 0x96f   : > { %p21_p4 = scmp.ge.s32.totalorder %s24_s29, 4  }
 0x971   :  { %23 = sbr.rel (!%p21_p4) target bundleno = 1 (0x1), region = 109 }

</bundles_post_ra>
